<compile_context>
chip_gen: v7x
topology: tpu7x:2x2x1
jax: 0.10.0
libtpu: 0.0.40
codegen_flags: <defaults>
</compile_context>

<pallas_src>
import math

import numpy as np
import jax
import jax.numpy as jnp
from jax.experimental import pallas as pl
from jax.experimental.pallas import tpu as pltpu

# ----------------------------- configuration --------------------------------
N_POINTS = 64                      # surface points
N_ATOMS = 32                       # atoms
ATOM_DIMS = 6                      # one-hot atom-type channels
CURV_SCALES = [1.0, 2.0, 3.0]      # curvature scales -> 2*S geometric features
IN_CHANNELS = 2 * len(CURV_SCALES) + ATOM_DIMS
ORIENT_UNITS = 16
EMB_DIMS = 16                      # dMaSIFConv hidden width == output width
N_LAYERS = 2
RADIUS = 9.0
CONV_CUTS = 8                      # hidden units of the in-kernel 3D MLP filter
N_BRANCH = 2                       # SearchModel has two embedding branches

HIGHEST = jax.lax.Precision.HIGHEST


def _round_up(n, m):
    return ((n + m - 1) // m) * m


# ------------------------------ small helpers -------------------------------
def leaky_relu(x, slope=0.2):
    return jnp.where(x >= 0, x, slope * x)


def linear(x, w, b):
    return x @ w.T + b


def l2_normalize(x, axis=-1, eps=1e-12):
    n = jnp.sqrt(jnp.sum(x * x, axis=axis, keepdims=True))
    return x / jnp.maximum(n, eps)


def group_norm_rows(x, num_groups, weight, bias, eps=1e-5):
    # PyTorch GroupNorm applied to a (N, C) tensor: per-row, per-group stats.
    N, C = x.shape
    xg = x.reshape(N, num_groups, C // num_groups)
    mean = xg.mean(axis=-1, keepdims=True)
    var = ((xg - mean) ** 2).mean(axis=-1, keepdims=True)
    xg = (xg - mean) / jnp.sqrt(var + eps)
    return xg.reshape(N, C) * weight + bias


def group_norm_channels(x, num_groups, weight, bias, eps=1e-5):
    # PyTorch GroupNorm applied to x.T[None] of shape (1, C, N): stats are
    # shared across all points inside each channel group (dMaSIFConv usage).
    N, C = x.shape
    xt = x.T.reshape(num_groups, (C // num_groups) * N)
    mean = xt.mean(axis=1, keepdims=True)
    var = ((xt - mean) ** 2).mean(axis=1, keepdims=True)
    xt = (xt - mean) / jnp.sqrt(var + eps)
    xn = xt.reshape(C, N) * weight[:, None] + bias[:, None]
    return xn.T


def tangent_vectors(normals):
    x, y, z = normals[..., 0], normals[..., 1], normals[..., 2]
    s = 2.0 * (z >= 0).astype(normals.dtype) - 1.0
    a = -1.0 / (s + z)
    b = x * y * a
    uv = jnp.stack([1.0 + s * x * x * a, s * b, -s * x, b, s + y * y * a, -y],
                   axis=-1)
    return uv.reshape(uv.shape[:-1] + (2, 3))


# ------------------------- Pallas pairwise kernels ---------------------------
# Layout inside the kernels:
#   * source points j live on the SUBLANE axis (padded to NPJ = round_up(N,8)),
#   * query points i live on the LANE axis (padded to NPI = round_up(N,128)),
#   * per-query data arrives as (8|k, NPI) rows, per-source data as (NPJ, 8)
#     columns / (k, NPJ) rows,
#   * outputs are written as dense (channels, NPI) rows (whole-tile stores)
#     and transposed back in the wrapper.

def _window_kernel(xc_ref, xr_ref, nc_ref, nr_ref, mc_ref, mr_ref, o_ref):
    # x_j.x_i and n_j.n_i on the MXU (depth-8, zero-padded operands).
    xdot = jnp.dot(xc_ref[...], xr_ref[...],
                   preferred_element_type=jnp.float32, precision=HIGHEST)
    ndot = jnp.dot(nc_ref[...], nr_ref[...],
                   preferred_element_type=jnp.float32, precision=HIGHEST)
    d2 = mc_ref[:, 0:1] + mr_ref[0:1, :] - 2.0 * xdot
    w = jnp.exp(-d2 * (2.0 - ndot) ** 2)
    o_ref[...] = w * mc_ref[:, 1:2]          # zero out padded j rows


def pallas_pairwise_window(points, normals):
    """Quasi-geodesic window: win[j, i] = exp(-|x_j-x_i|^2 (2 - n_i.n_j)^2)."""
    N = points.shape[0]
    NPI = _round_up(N, 128)
    NPJ = _round_up(N, 8)
    p = points.astype(jnp.float32)
    nn = normals.astype(jnp.float32)

    xc = jnp.zeros((NPJ, 8), jnp.float32).at[:N, 0:3].set(p)
    nc = jnp.zeros((NPJ, 8), jnp.float32).at[:N, 0:3].set(nn)
    xr = jnp.zeros((8, NPI), jnp.float32).at[0:3, :N].set(p.T)
    nr = jnp.zeros((8, NPI), jnp.float32).at[0:3, :N].set(nn.T)
    mc = jnp.zeros((NPJ, 8), jnp.float32)
    mc = mc.at[:N, 0].set(jnp.sum(p * p, axis=1))   # |x_j|^2
    mc = mc.at[:N, 1].set(1.0)                      # valid-j mask
    mr = jnp.zeros((8, NPI), jnp.float32)
    mr = mr.at[0, :N].set(jnp.sum(p * p, axis=1))   # |x_i|^2

    vmem = pl.BlockSpec(memory_space=pltpu.MemorySpace.VMEM)
    return pl.pallas_call(
        _window_kernel,
        out_shape=jax.ShapeDtypeStruct((NPJ, NPI), jnp.float32),
        in_specs=[vmem] * 6,
        out_specs=vmem,
    )(xc, xr, nc, nr, mc, mr)


def _make_conv_kernel(np_i, np_j, c_hid, h_out, jc):
    n_chunks = np_j // jc

    def kernel(win_ref, xj_ref, m_ref, f_ref, a2_ref, b2_ref, out_ref):
        g = pl.program_id(0)
        accs = [jnp.zeros((1, np_i), jnp.float32) for _ in range(h_out)]
        # Loop the source (sublane) axis in small chunks to cap live vregs.
        for ck in range(n_chunks):
            j0 = ck * jc
            win_c = win_ref[j0:j0 + jc, :]            # (jc, NPI)
            xj_c = xj_ref[j0:j0 + jc, :]              # (jc, 8): x_j, 1, 0...

            # Layer 1 on the MXU: pre_c = x_j . M[i,c,:] + (b1[c] - M[i,c,:].x_i)
            h1 = []
            for c in range(c_hid):
                pre = jnp.dot(xj_c, m_ref[8 * c:8 * c + 8, :],
                              preferred_element_type=jnp.float32,
                              precision=HIGHEST)
                h1.append(jnp.maximum(pre, 0.0))

            # Layer 2 (VPU) + windowed j-reduction per output channel (MXU).
            for h in range(h_out):
                acc = a2_ref[g, h * c_hid] * h1[0]
                for c in range(1, c_hid):
                    acc = acc + a2_ref[g, h * c_hid + c] * h1[c]
                filt = jnp.maximum(acc + b2_ref[g, h], 0.0)   # (jc, NPI)
                wf = win_c * filt
                frow = f_ref[h:h + 1, j0:j0 + jc]             # (1, jc)
                accs[h] = accs[h] + jnp.dot(
                    frow, wf, preferred_element_type=jnp.float32,
                    precision=HIGHEST)
        out_ref[...] = jnp.concatenate(accs, axis=0)          # (H, NPI)
    return kernel


def pallas_conv_reduce_grouped(window, points, nuv_g, feat_g, A1_g, b1_g,
                               A2_g, b2_g):
    """Grouped dMaSIFConv quasi-geodesic reduction.

    out[g, i, h] = sum_j win[j,i]
                   * relu(A2_g relu(A1_g (nuv_g[i] (x_j - x_i)) + b1_g) + b2_g)[h]
                   * feat_g[j, h]
    """
    G, N, H = feat_g.shape
    C = A1_g.shape[1]
    NPJ, NPI = window.shape
    JC = 16 if NPJ % 16 == 0 else 8
    p = points.astype(jnp.float32)

    # Fold A1 into the per-point frames:  M[g,i,c,b] = sum_a A1[g,c,a] nuv[g,i,a,b]
    M = jnp.einsum('gca,giab->gicb', A1_g.astype(jnp.float32),
                   nuv_g.astype(jnp.float32), precision=HIGHEST)   # (G,N,C,3)
    # Per-query constant folded into the matmul: cb[g,c,i] = b1 - M[i,c,:].x_i
    cb = b1_g.astype(jnp.float32)[:, :, None] - jnp.einsum(
        'gicb,ib->gci', M, p, precision=HIGHEST)                    # (G,C,N)

    m8 = jnp.zeros((G, C, 8, NPI), jnp.float32)
    m8 = m8.at[:, :, 0:3, :N].set(jnp.transpose(M, (0, 2, 3, 1)))
    m8 = m8.at[:, :, 3, :N].set(cb)
    m8 = m8.reshape(G, 8 * C, NPI)

    xj8 = jnp.zeros((NPJ, 8), jnp.float32)
    xj8 = xj8.at[:N, 0:3].set(p)
    xj8 = xj8.at[:, 3].set(1.0)

    ft = jnp.zeros((G, H, NPJ), jnp.float32)
    ft = ft.at[:, :, :N].set(jnp.transpose(feat_g.astype(jnp.float32),
                                           (0, 2, 1)))

    smem = pl.BlockSpec(memory_space=pltpu.MemorySpace.SMEM)
    kernel = _make_conv_kernel(NPI, NPJ, C, H, JC)
    out = pl.pallas_call(
        kernel,
        out_shape=jax.ShapeDtypeStruct((G, H, NPI), jnp.float32),
        grid=(G,),
        in_specs=[
            pl.BlockSpec((NPJ, NPI), lambda g: (0, 0)),     # shared window
            pl.BlockSpec((NPJ, 8), lambda g: (0, 0)),       # source coords
            pl.BlockSpec((None, 8 * C, NPI), lambda g: (g, 0, 0)),  # folded A1
            pl.BlockSpec((None, H, NPJ), lambda g: (g, 0, 0)),      # features^T
            smem, smem,                                     # A2, b2
        ],
        out_specs=pl.BlockSpec((None, H, NPI), lambda g: (g, 0, 0)),
        compiler_params=pltpu.CompilerParams(
            dimension_semantics=("parallel",)),             # 2 branches -> 2 TCs
    )(window, xj8, m8, ft,
      A2_g.reshape(G, H * C).astype(jnp.float32), b2_g.astype(jnp.float32))
    return jnp.transpose(out[:, :, :N], (0, 2, 1))          # (G, N, H)


def _make_orient_kernel(np_i, n_groups):
    def kernel(win_ref, xj_ref, ur_ref, vr_ref, w_ref, o_ref):
        win = win_ref[...]                                   # (NPJ, NPI)
        # xu[j,i] = u_i.(x_j - x_i), xv likewise, via depth-8 MXU matmuls.
        xu = jnp.dot(xj_ref[...], ur_ref[...],
                     preferred_element_type=jnp.float32, precision=HIGHEST)
        xv = jnp.dot(xj_ref[...], vr_ref[...],
                     preferred_element_type=jnp.float32, precision=HIGHEST)
        wxu = win * xu
        wxv = win * xv
        rows = []
        for g in range(n_groups):
            wg = w_ref[g:g + 1, :]                           # (1, NPJ)
            rows.append(jnp.dot(wg, wxu, preferred_element_type=jnp.float32,
                                precision=HIGHEST))
            rows.append(jnp.dot(wg, wxv, preferred_element_type=jnp.float32,
                                precision=HIGHEST))
        for _ in range(8 - 2 * n_groups):                    # pad to 8 rows
            rows.append(jnp.zeros((1, np_i), jnp.float32))
        o_ref[...] = jnp.concatenate(rows, axis=0)           # (8, NPI)
    return kernel


def pallas_orientation_grouped(window, points, uv, weights_g):
    """load_mesh orientation-vector reduction, both branches in one call.

    out[g, i, :] = sum_j win[j,i] * w_g[j] * (uv_i (x_j - x_i))
    """
    N = points.shape[0]
    G = weights_g.shape[0]
    NPJ, NPI = window.shape
    p = points.astype(jnp.float32)
    u = uv[:, 0, :].astype(jnp.float32)
    v = uv[:, 1, :].astype(jnp.float32)

    xj8 = jnp.zeros((NPJ, 8), jnp.float32)
    xj8 = xj8.at[:N, 0:3].set(p)
    xj8 = xj8.at[:, 3].set(1.0)

    ur8 = jnp.zeros((8, NPI), jnp.float32)
    ur8 = ur8.at[0:3, :N].set(u.T)
    ur8 = ur8.at[3, :N].set(-jnp.sum(u * p, axis=1))
    vr8 = jnp.zeros((8, NPI), jnp.float32)
    vr8 = vr8.at[0:3, :N].set(v.T)
    vr8 = vr8.at[3, :N].set(-jnp.sum(v * p, axis=1))

    wrows = jnp.zeros((8, NPJ), jnp.float32)
    wrows = wrows.at[:G, :N].set(weights_g[:, :, 0].astype(jnp.float32))

    vmem = pl.BlockSpec(memory_space=pltpu.MemorySpace.VMEM)
    out = pl.pallas_call(
        _make_orient_kernel(NPI, G),
        out_shape=jax.ShapeDtypeStruct((8, NPI), jnp.float32),
        in_specs=[vmem] * 5,
        out_specs=vmem,
    )(window, xj8, ur8, vr8, wrows)
    out = out[:2 * G, :N].reshape(G, 2, N)
    return jnp.transpose(out, (0, 2, 1))                     # (G, N, 2)


# ----------------------- geometric features (plain JAX) ----------------------
def curvatures(vertices, normals, scales, reg=0.01):
    """Mean / Gaussian curvature estimates at several scales -> (N, 2*S)."""
    diff = vertices[:, None, :] - vertices[None, :, :]
    d2 = jnp.sum(diff * diff, axis=-1)
    feats = []
    for scale in scales:
        K = jnp.exp(-d2 / (2.0 * scale * scale))               # Gaussian window
        ns = l2_normalize(K @ normals, axis=-1)                # smoothed normals
        uv = tangent_vectors(ns)                               # (N, 2, 3)
        dxv = vertices[None, :, :] - vertices[:, None, :]      # x_j - x_i
        P = jnp.einsum('iad,ijd->ija', uv, dxv)                # (N, N, 2)
        dn = ns[None, :, :] - ns[:, None, :]
        Q = jnp.einsum('iad,ijd->ija', uv, dn)                 # (N, N, 2)
        PPt = jnp.einsum('ij,ija,ijb->iab', K, P, P) + reg * jnp.eye(2)
        PQt = jnp.einsum('ij,ija,ijb->iab', K, P, Q)
        a_, b_ = PPt[:, 0, 0], PPt[:, 0, 1]
        c_, d_ = PPt[:, 1, 0], PPt[:, 1, 1]
        det = a_ * d_ - b_ * c_
        inv = jnp.stack([jnp.stack([d_, -b_], -1),
                         jnp.stack([-c_, a_], -1)], -2) / det[:, None, None]
        S = jnp.einsum('iab,ibc->iac', inv, PQt)
        sa, sb, sc, sd = S[:, 0, 0], S[:, 0, 1], S[:, 1, 0], S[:, 1, 1]
        feats.append(jnp.clip(sa + sd, -1.0, 1.0))             # mean curvature
        feats.append(jnp.clip(sa * sd - sb * sc, -1.0, 1.0))   # gauss curvature
    return jnp.stack(feats, axis=-1)


def knn(x, y, k):
    d2 = jnp.sum((x[:, None, :] - y[None, :, :]) ** 2, axis=-1)
    _, idx = jax.lax.top_k(-d2, k)
    dists = jnp.take_along_axis(d2, idx, axis=1)               # squared dists
    return idx, dists


def atomnet_forward(p, xyz, atom_xyz, atom_types):
    """AtomNetMP: atom-type transform + atom-atom MP + point-atom MP."""
    t = leaky_relu(linear(atom_types, *p['tt1']))
    t = linear(t, *p['tt2'])

    # Atom -> atom message passing (k = 17, self removed).
    idx, dists = knn(atom_xyz, atom_xyz, 17)
    idx, dists = idx[:, 1:], dists[:, 1:]
    out = t
    for lp in p['aa']:
        nbr = out[idx]                                         # (Na, 16, D)
        center = jnp.broadcast_to(out[:, None, :], nbr.shape)
        feats = jnp.concatenate([center, nbr, dists[..., None]], axis=-1)
        m = leaky_relu(linear(feats, *lp['l1']))
        m = linear(m, *lp['l2']).sum(axis=1)
        out = out + leaky_relu(group_norm_rows(m, 2, *lp['gn']))

    # Surface point <- atom message passing (k = 16).
    idx2, dists2 = knn(xyz, atom_xyz, 16)
    emb = jnp.ones((xyz.shape[0], out.shape[1]), jnp.float32)
    for lp in p['pa']:
        nbr = out[idx2]
        center = jnp.broadcast_to(emb[:, None, :], nbr.shape)
        feats = jnp.concatenate([center, nbr, dists2[..., None]], axis=-1)
        m = leaky_relu(linear(feats, *lp['l1']))
        m = linear(m, *lp['l2']).sum(axis=1)
        emb = emb + leaky_relu(group_norm_rows(m, 2, *lp['gn']))
    return emb


# ------------------------------ dMaSIF conv ----------------------------------
def load_mesh_grouped(xyz, normals, weights_g, radius):
    """Build per-branch local frames nuv (G, N, 3, 3) with one Pallas call."""
    points = xyz / radius
    uv = tangent_vectors(normals)                              # (N, 2, 3) shared
    window = pallas_pairwise_window(points, normals)
    ov = pallas_orientation_grouped(window, points, uv, weights_g)  # (G, N, 2)
    ov = l2_normalize(ov + 1e-5, axis=-1)
    u, v = uv[:, 0, :], uv[:, 1, :]
    nuv_list = []
    for g in range(ov.shape[0]):
        ex, ey = ov[g, :, 0:1], ov[g, :, 1:2]
        tb = jnp.concatenate([ex * u + ey * v, -ey * u + ex * v],
                             axis=1).reshape(-1, 2, 3)
        nuv_list.append(jnp.concatenate([normals[:, None, :], tb], axis=1))
    return jnp.stack(nuv_list)                                 # (G, N, 3, 3)


def conv_seg_forward_grouped(conv_params, features, points, normals, nuv_g,
                             radius):
    """dMaSIFConv_seg for all branches; one Pallas call per conv layer."""
    G = nuv_g.shape[0]
    xs = [features] * G
    n_layers = len(conv_params[0]['layers'])
    pts = points / (math.sqrt(2.0) * radius)
    # The exp window only depends on points/normals: compute it once and share
    # it across layers and branches.
    window = pallas_pairwise_window(pts, normals)
    for l in range(n_layers):
        feats, A1s, b1s, A2s, b2s = [], [], [], [], []
        for g in range(G):
            lp = conv_params[g]['layers'][l]
            f = leaky_relu(linear(xs[g], *lp['in1']))
            f = leaky_relu(linear(f, *lp['in2']))
            f = group_norm_channels(f, 4, *lp['gn_in'])
            feats.append(f)
            A1s.append(lp['A1']); b1s.append(lp['b1'])
            A2s.append(lp['A2']); b2s.append(lp['b2'])
        conv_out = pallas_conv_reduce_grouped(
            window, pts, nuv_g, jnp.stack(feats),
            jnp.stack(A1s), jnp.stack(b1s), jnp.stack(A2s), jnp.stack(b2s))
        new_xs = []
        for g in range(G):
            lp = conv_params[g]['layers'][l]
            o = leaky_relu(linear(conv_out[g], *lp['out1']))
            o = leaky_relu(linear(o, *lp['out2']))
            o = group_norm_channels(o, 4, *lp['gn_out'])
            (w1, bb1), (w2, bb2) = conv_params[g]['linear_layers'][l]
            o = linear(jnp.maximum(linear(o, w1, bb1), 0.0), w2, bb2)
            xg = linear(xs[g], *conv_params[g]['linear_transform'][l])
            new_xs.append(xg + o)
        xs = new_xs
    return xs


def orientation_scores(p, features):
    h = leaky_relu(linear(features, *p['orient1']))
    return linear(h, *p['orient2'])                            # (N, 1)


def search_model_forward(params, surface_xyz, surface_normals,
                         atom_coords, atom_types, split_idx=0):
    curv = curvatures(surface_xyz, surface_normals, CURV_SCALES)
    chem = atomnet_forward(params['atomnet'], surface_xyz, atom_coords,
                           atom_types)
    features = jnp.concatenate([curv, chem], axis=1)           # (N, IN_CHANNELS)
    # nn.Dropout -> inference (eval) semantics: identity.
    s1 = orientation_scores(params['branch1'], features)
    s2 = orientation_scores(params['branch2'], features)
    nuv_g = load_mesh_grouped(surface_xyz, surface_normals,
                              jnp.stack([s1, s2]), RADIUS)
    embeds = conv_seg_forward_grouped(
        [params['branch1']['conv'], params['branch2']['conv']],
        features, surface_xyz, surface_normals, nuv_g, RADIUS)
    return embeds[0], embeds[1]


# --------------------------- parameter construction --------------------------
class KeyGen:
    def __init__(self, seed):
        self._key = jax.random.PRNGKey(seed)

    def __call__(self):
        self._key, sub = jax.random.split(self._key)
        return sub


def init_linear(kg, in_f, out_f):
    bound = 1.0 / math.sqrt(in_f)
    w = jax.random.uniform(kg(), (out_f, in_f), jnp.float32, -bound, bound)
    b = jax.random.uniform(kg(), (out_f,), jnp.float32, -bound, bound)
    return (w, b)


def init_group_norm(c):
    return (jnp.ones((c,), jnp.float32), jnp.zeros((c,), jnp.float32))


def init_atomnet(kg, D):
    def mp_layer():
        return {'l1': init_linear(kg, 2 * D + 1, 2 * D + 1),
                'l2': init_linear(kg, 2 * D + 1, D),
                'gn': init_group_norm(D)}
    return {'tt1': init_linear(kg, D, D), 'tt2': init_linear(kg, D, D),
            'aa': [mp_layer() for _ in range(3)],
            'pa': [mp_layer() for _ in range(3)]}


def init_dmasif_conv(kg, I, O):
    H = O
    A1 = jax.random.normal(kg(), (CONV_CUTS, 3), jnp.float32)
    b1 = jax.random.uniform(kg(), (CONV_CUTS,), jnp.float32) * \
        (0.8 * jnp.sqrt((A1 ** 2).sum(-1)))
    A2 = jax.random.uniform(kg(), (H, CONV_CUTS), jnp.float32,
                            -1.0 / math.sqrt(CONV_CUTS), 1.0 / math.sqrt(CONV_CUTS))
    b2 = jax.random.normal(kg(), (H,), jnp.float32) * \
        (0.5 * jnp.sqrt((A2 ** 2).sum(-1)))
    return {'in1': init_linear(kg, I, H), 'in2': init_linear(kg, H, H),
            'gn_in': init_group_norm(H),
            'A1': A1, 'b1': b1, 'A2': A2, 'b2': b2,
            'out1': init_linear(kg, H, O), 'out2': init_linear(kg, O, O),
            'gn_out': init_group_norm(O)}


def init_conv_seg(kg, I, O, n_layers):
    dims = [I] + [O] * (n_layers - 1)
    return {'layers': [init_dmasif_conv(kg, dims[l], O) for l in range(n_layers)],
            'linear_layers': [(init_linear(kg, O, O), init_linear(kg, O, O))
                              for _ in range(n_layers)],
            'linear_transform': [init_linear(kg, dims[l], O)
                                 for l in range(n_layers)]}


def init_branch(kg):
    return {'orient1': init_linear(kg, IN_CHANNELS, ORIENT_UNITS),
            'orient2': init_linear(kg, ORIENT_UNITS, 1),
            'conv': init_conv_seg(kg, IN_CHANNELS, EMB_DIMS, N_LAYERS)}


def init_search_model(kg):
    return {'atomnet': init_atomnet(kg, ATOM_DIMS),
            'branch1': init_branch(kg), 'branch2': init_branch(kg)}


# --------------------------- pure-JAX kernel refs ----------------------------
def conv_reduce_ref(points, normals, nuv, feat, A1, b1, A2, b2):
    dx = points[None, :, :] - points[:, None, :]
    d2 = (dx * dx).sum(-1)
    ndot = (normals[:, None, :] * normals[None, :, :]).sum(-1)
    window = jnp.exp(-d2 * (2.0 - ndot) ** 2)
    X = jnp.einsum('iab,ijb->ija', nuv, dx, precision=HIGHEST)
    h1 = jnp.maximum(jnp.einsum('ca,ija->ijc', A1, X, precision=HIGHEST) + b1,
                     0.0)
    h2 = jnp.maximum(jnp.einsum('hc,ijc->ijh', A2, h1, precision=HIGHEST) + b2,
                     0.0)
    return (window[:, :, None] * h2 * feat[None, :, :]).sum(1)


def orientation_reduce_ref(points, normals, uv, weights):
    dx = points[None, :, :] - points[:, None, :]
    d2 = (dx * dx).sum(-1)
    ndot = (normals[:, None, :] * normals[None, :, :]).sum(-1)
    window = jnp.exp(-d2 * (2.0 - ndot) ** 2)
    X = jnp.einsum('iad,ijd->ija', uv, dx, precision=HIGHEST)
    return (window[:, :, None] * weights[None, :, 0][:, :, None] * X).sum(1)


# ---------------------------------- main -------------------------------------
if __name__ == "__main__":
    kg = KeyGen(0)
    params = init_search_model(kg)

    dkeys = jax.random.split(jax.random.PRNGKey(0), 5)
    surface_xyz = 3.0 * jax.random.normal(dkeys[0], (N_POINTS, 3), jnp.float32)
    surface_normals = l2_normalize(
        jax.random.normal(dkeys[1], (N_POINTS, 3), jnp.float32))
    atom_coords = 3.0 * jax.random.normal(dkeys[2], (N_ATOMS, 3), jnp.float32)
    atom_types = jax.nn.one_hot(
        jax.random.randint(dkeys[3], (N_ATOMS,), 0, ATOM_DIMS),
        ATOM_DIMS, dtype=jnp.float32)

    # --- sanity-check the grouped Pallas kernels against pure-JAX refs -------
    tkeys = jax.random.split(dkeys[4], 8)
    G = N_BRANCH
    tp = 0.2 * jax.random.normal(tkeys[0], (N_POINTS, 3), jnp.float32)
    tn = l2_normalize(jax.random.normal(tkeys[1], (N_POINTS, 3), jnp.float32))
    tuv = tangent_vectors(tn)                                   # (N, 2, 3)
    frames_a = jnp.concatenate([tn[:, None, :], tuv], axis=1)   # [n, u, v]
    frames_b = jnp.concatenate([tn[:, None, :], tuv[:, ::-1, :]], axis=1)
    tnuv_g = jnp.stack([frames_a, frames_b])                    # (G, N, 3, 3)
    tf_g = jax.random.normal(tkeys[2], (G, N_POINTS, EMB_DIMS), jnp.float32)
    tA1 = jax.random.normal(tkeys[3], (G, CONV_CUTS, 3), jnp.float32)
    tb1 = jax.random.normal(tkeys[4], (G, CONV_CUTS), jnp.float32)
    tA2 = jax.random.normal(tkeys[5], (G, EMB_DIMS, CONV_CUTS), jnp.float32)
    tb2 = jax.random.normal(tkeys[6], (G, EMB_DIMS), jnp.float32)
    tw = jax.random.normal(tkeys[7], (G, N_POINTS, 1), jnp.float32)

    win_t = pallas_pairwise_window(tp, tn)
    got = pallas_conv_reduce_grouped(win_t, tp, tnuv_g, tf_g,
                                     tA1, tb1, tA2, tb2)
    for g in range(G):
        want = conv_reduce_ref(tp, tn, tnuv_g[g], tf_g[g],
                               tA1[g], tb1[g], tA2[g], tb2[g])
        np.testing.assert_allclose(np.asarray(got[g]), np.asarray(want),
                                   rtol=3e-3, atol=3e-3)

    got_o = pallas_orientation_grouped(win_t, tp, tuv, tw)
    for g in range(G):
        want_o = orientation_reduce_ref(tp, tn, tuv, tw[g])
        np.testing.assert_allclose(np.asarray(got_o[g]), np.asarray(want_o),
                                   rtol=3e-3, atol=3e-3)

    # --- full SearchModel forward --------------------------------------------
    forward = jax.jit(search_model_forward)
    embed_1, embed_2 = forward(params, surface_xyz, surface_normals,
                               atom_coords, atom_types, 0)
    jax.block_until_ready((embed_1, embed_2))

    assert embed_1.shape == (N_POINTS, EMB_DIMS)
    assert embed_2.shape == (N_POINTS, EMB_DIMS)
    assert bool(jnp.all(jnp.isfinite(embed_1)))
    assert bool(jnp.all(jnp.isfinite(embed_2)))
    print("KERNEL_OK")
</pallas_src>

<mosaic_0001>
module attributes {stable_mosaic.version = 11 : i64} {
  func.func @_window_kernel(%arg0: memref<64x8xf32, #tpu.memory_space<vmem>>, %arg1: memref<8x128xf32, #tpu.memory_space<vmem>>, %arg2: memref<64x8xf32, #tpu.memory_space<vmem>>, %arg3: memref<8x128xf32, #tpu.memory_space<vmem>>, %arg4: memref<64x8xf32, #tpu.memory_space<vmem>>, %arg5: memref<8x128xf32, #tpu.memory_space<vmem>>, %arg6: memref<64x128xf32, #tpu.memory_space<vmem>>) attributes {dimension_semantics = [], scalar_prefetch = 0 : i64, scratch_operands = 0 : i64, tpu.core_type = #tpu.core_type<tc>} {
    %c0 = arith.constant 0 : index
    %c0_0 = arith.constant 0 : index
    %0 = vector.load %arg0[%c0, %c0_0] : memref<64x8xf32, #tpu.memory_space<vmem>>, vector<64x8xf32>
    %c0_1 = arith.constant 0 : index
    %c0_2 = arith.constant 0 : index
    %1 = vector.load %arg1[%c0_1, %c0_2] : memref<8x128xf32, #tpu.memory_space<vmem>>, vector<8x128xf32>
    %cst = arith.constant dense<0.000000e+00> : vector<64x128xf32>
    %2 = tpu.matmul %0, %1, %cst {dimension_numbers = #tpu.dot_dimension_numbers<[1], [0], [0], [1], [0, 0, 1, 1], [], []>, precision = #tpu.contract_precision<fp32>} : vector<64x8xf32>, vector<8x128xf32>, vector<64x128xf32> -> vector<64x128xf32>
    %c0_3 = arith.constant 0 : index
    %c0_4 = arith.constant 0 : index
    %3 = vector.load %arg2[%c0_3, %c0_4] : memref<64x8xf32, #tpu.memory_space<vmem>>, vector<64x8xf32>
    %c0_5 = arith.constant 0 : index
    %c0_6 = arith.constant 0 : index
    %4 = vector.load %arg3[%c0_5, %c0_6] : memref<8x128xf32, #tpu.memory_space<vmem>>, vector<8x128xf32>
    %cst_7 = arith.constant dense<0.000000e+00> : vector<64x128xf32>
    %5 = tpu.matmul %3, %4, %cst_7 {dimension_numbers = #tpu.dot_dimension_numbers<[1], [0], [0], [1], [0, 0, 1, 1], [], []>, precision = #tpu.contract_precision<fp32>} : vector<64x8xf32>, vector<8x128xf32>, vector<64x128xf32> -> vector<64x128xf32>
    %c0_8 = arith.constant 0 : index
    %c0_9 = arith.constant 0 : index
    %6 = vector.load %arg4[%c0_8, %c0_9] : memref<64x8xf32, #tpu.memory_space<vmem>>, vector<64x1xf32>
    %c0_10 = arith.constant 0 : index
    %c0_11 = arith.constant 0 : index
    %7 = vector.load %arg5[%c0_10, %c0_11] : memref<8x128xf32, #tpu.memory_space<vmem>>, vector<1x128xf32>
    %8 = vector.broadcast %6 : vector<64x1xf32> to vector<64x128xf32>
    %9 = vector.broadcast %7 : vector<1x128xf32> to vector<64x128xf32>
    %10 = arith.addf %8, %9 : vector<64x128xf32>
    %cst_12 = arith.constant 2.000000e+00 : f32
    %11 = vector.broadcast %cst_12 : f32 to vector<64x128xf32>
    %12 = arith.mulf %11, %2 : vector<64x128xf32>
    %13 = arith.subf %10, %12 : vector<64x128xf32>
    %cst_13 = arith.constant 0.000000e+00 : f32
    %14 = vector.broadcast %cst_13 : f32 to vector<64x128xf32>
    %15 = arith.subf %14, %13 : vector<64x128xf32>
    %cst_14 = arith.constant 2.000000e+00 : f32
    %16 = vector.broadcast %cst_14 : f32 to vector<64x128xf32>
    %17 = arith.subf %16, %5 : vector<64x128xf32>
    %18 = arith.mulf %17, %17 : vector<64x128xf32>
    %19 = arith.mulf %15, %18 : vector<64x128xf32>
    %20 = math.exp %19 : vector<64x128xf32>
    %c0_15 = arith.constant 0 : index
    %c1 = arith.constant 1 : index
    %21 = vector.load %arg4[%c0_15, %c1] : memref<64x8xf32, #tpu.memory_space<vmem>>, vector<64x1xf32>
    %22 = vector.broadcast %21 : vector<64x1xf32> to vector<64x128xf32>
    %23 = arith.mulf %20, %22 : vector<64x128xf32>
    %c0_16 = arith.constant 0 : index
    %c0_17 = arith.constant 0 : index
    %24 = vector.load %arg6[%c0_16, %c0_17] : memref<64x128xf32, #tpu.memory_space<vmem>>, vector<64x128xf32>
    tpu.vector_store %arg6[%c0_16, %c0_17], %23 {strides = array<i32>} : memref<64x128xf32, #tpu.memory_space<vmem>>, vector<64x128xf32>,
    return
  }
}

</mosaic_0001>

<bundles_post_ra>
// kernel: tpu_custom_call.1
= control target key start
LH: loop header
LB: loop body
LE: loop exit
PB: predicated region body
PF: predicated region fallthrough
CT: control target
= control target key end

     0   :  { %vm33_vm0 = vcmask 64512   ;;  %v2180_v9 = vmov 0   ;;  %s2633_s0 = inlined_call_operand.vmem [shape: f32[64,8], index: 0, kind: input, shape index: {}]   ;;  %s2634_s1 = inlined_call_operand.vmem [shape: f32[8,128], index: 1, kind: input, shape index: {}]   ;;  %s2635_s2 = inlined_call_operand.vmem [shape: f32[64,8], index: 2, kind: input, shape index: {}]   ;;  %s2636_s3 = inlined_call_operand.vmem [shape: f32[8,128], index: 3, kind: input, shape index: {}]   ;;  %s2637_s4 = inlined_call_operand.vmem [shape: f32[64,8], index: 4, kind: input, shape index: {}]   ;;  %s2638_s5 = inlined_call_operand.vmem [shape: f32[8,128], index: 5, kind: input, shape index: {}]   ;;  %s2639_s6 = inlined_call_operand.hbm [shape: f32[64,128], index: 6, kind: output, shape index: {}]  }
   0x1   :  { %v32_v0 = vld [vmem:[%s2634_s1] sm:$0xff]  ;;  %v25_v7 = vld [vmem:[%s2633_s0 + $0x8] sm:$0xff]  ;;  %2137 = vset.pattern.permute.xlu1 %v2180_v9  ;;  %2136 = vset.pattern.permute.xlu0 %v2180_v9  ;;  %v26_v14 = vld [vmem:[%s2633_s0 + $0x10] sm:$0xff] }
   0x2   :  { %v813_v1 = vld [vmem:[%s2636_s3] sm:$0xff]  ;;  %v2229_v3 = vand.u32 4294901760, %v32_v0  ;;  %v806_v8 = vld [vmem:[%s2635_s2 + $0x8] sm:$0xff]  ;;  %v38_v12 = vsel %vm33_vm0, %v25_v7, 0  ;;  %v807_v15 = vld [vmem:[%s2635_s2 + $0x10] sm:$0xff]  ;;  %v41_v22 = vsel %vm33_vm0, %v26_v14, 0 }
   0x3   :  { %v24_v2 = vld [vmem:[%s2633_s0] sm:$0xff]  ;;  %v2231_v4 = vand.u32 4294901760, %v813_v1  ;;  %v818_v13 = vsel %vm33_vm0, %v806_v8, 0  ;;  %v2261_v18 = vand.u32 4294901760, %v38_v12  ;;  %v821_v23 = vsel %vm33_vm0, %v807_v15, 0  ;;  %v2298_v32 = vld [vmem:[%s2637_s4 + $0x10] sm:$0xff] }
   0x4   :  { %v35_v5 = vsel %vm33_vm0, %v24_v2, 0  ;;  %v805_v6 = vld [vmem:[%s2635_s2] sm:$0xff]  ;;  %1883 = vmatprep.subr.mxu0 %v2229_v3  ;;  %v2257_v16 = vsub.f32 %v32_v0, %v2229_v3  ;;  %v2263_v19 = vand.u32 4294901760, %v818_v13  ;;  %v2291_v30 = vand.u32 4294901760, %v41_v22  ;;  %1606 = vperm.xlu1 %2137, %v2298_v32   ;;  %v27_v42 = vld [vmem:[%s2633_s0 + $0x18] sm:$0xff] }
   0x5   :  { %v2243_v10 = vand.u32 4294901760, %v35_v5  ;;  %v815_v11 = vsel %vm33_vm0, %v805_v6, 0  ;;  %1967 = vmatprep.subr.mxu1 %v2231_v4  ;;  %1884 = vmatpush3.msra.mxu0 %v2229_v3  ;;  %v2271_v21 = vsub.f32 %v813_v1, %v2231_v4  ;;  %v2282_v26 = vsub.f32 %v38_v12, %v2261_v18  ;;  %v2309_v37 = vld [vmem:[%s2637_s4] sm:$0xff]  ;;  %v2329_v43 = vld [vmem:[%s2637_s4 + $0x18] sm:$0xff] }
   0x6   :  { %v2259_v17 = vand.u32 4294901760, %v815_v11  ;;  %1968 = vmatpush3.msra.mxu1 %v2231_v4  ;;  %v2276_v24 = vand.u32 4294901760, %v2257_v16  ;;  %v2285_v27 = vsub.f32 %v818_v13, %v2263_v19  ;;  %v2293_v31 = vand.u32 4294901760, %v821_v23  ;;  %1596 = vperm.xlu0 %2136, %v2309_v37   ;;  %v808_v48 = vld [vmem:[%s2635_s2 + $0x18] sm:$0xff]  ;;  %v28_v49 = vld [vmem:[%s2633_s0 + $0x20] sm:$0xff] }
   0x7   :  { %v2267_v20 = vsub.f32 %v35_v5, %v2243_v10  ;;  %v2289_v29 = vand.u32 4294901760, %v2271_v21  ;;  %v136_v35 = vand.u32 4294901760, %v2282_v26  ;;  %v2317_v40 = vsub.f32 %v41_v22, %v2291_v30 }
   0x8   :  { %v2279_v25 = vsub.f32 %v815_v11, %v2259_v17  ;;  %v208_v33 = vsub.f32 %v2257_v16, %v2276_v24  ;;  %v916_v36 = vand.u32 4294901760, %v2285_v27  ;;  %v2320_v41 = vsub.f32 %v821_v23, %v2293_v31 }
   0x9   :  { %v126_v28 = vand.u32 4294901760, %v2267_v20  ;;  %v988_v39 = vsub.f32 %v2271_v21, %v2289_v29  ;;  %v137_v46 = vsub.f32 %v2282_v26, %v136_v35 }
   0xa   :  { %v906_v34 = vand.u32 4294901760, %v2279_v25  ;;  %v209_v44 = vand.u32 4294901760, %v208_v33  ;;  %v917_v47 = vsub.f32 %v2285_v27, %v916_v36 }
   0xb   :  { %v127_v38 = vsub.f32 %v2267_v20, %v126_v28 }
   0xc   :  { %v907_v45 = vsub.f32 %v2279_v25, %v906_v34 }
   0xd   :  { %11 = vsyncpa [#allocation3], 0  ;;  %v128_v50 = vand.u32 4294901760, %v127_v38  ;;  %v989_v51 = vand.u32 4294901760, %v988_v39  ;;  %v146_v52 = vand.u32 4294901760, %v2317_v40  ;;  %v2646_v53 = vand.u32 4294901760, %v2320_v41  ;;  %1897 = vmatprep.subr.mxu0 %v209_v44  ;;  %1611 = vperm.xlu1 %2137, %v2329_v43  }
   0xe   :  { %v809_v54 = vld [vmem:[%s2635_s2 + $0x20] sm:$0xff]  ;;  %v29_v55 = vld [vmem:[%s2633_s0 + $0x28] sm:$0xff]  ;;  %v908_v56 = vand.u32 4294901760, %v907_v45  ;;  %v138_v57 = vand.u32 4294901760, %v137_v46  ;;  %v918_v58 = vand.u32 4294901760, %v917_v47  ;;  %v44_v59 = vsel %vm33_vm0, %v27_v42, 0 }
   0xf   :  { %1885 = vmatprep.mubr.f32.mxu0 %v128_v50  ;;  %1981 = vmatprep.subr.mxu1 %v989_v51  ;;  %v147_v60 = vsub.f32 %v2317_v40, %v146_v52  ;;  %v927_v61 = vsub.f32 %v2320_v41, %v2646_v53  ;;  %v2362_v62 = vand.u32 4294901760, %v44_v59  ;;  %v824_v63 = vsel %vm33_vm0, %v808_v48, 0  ;;  %v810_v0 = vld [vmem:[%s2635_s2 + $0x28] sm:$0xff]  ;;  %v30_v7 = vld [vmem:[%s2633_s0 + $0x30] sm:$0xff] }
  0x10   :  { %1969 = vmatprep.mubr.f32.mxu1 %v908_v56  ;;  %1886 = vmatmul.mubr.f32.vlgmr.msra.gmra.mrb[0].mxu0 %v138_v57  ;;  %v2368_v1 = vand.u32 4294901760, %v824_v63  ;;  %v47_v2 = vsel %vm33_vm0, %v28_v49, 0  ;;  %v827_v5 = vsel %vm33_vm0, %v809_v54, 0  ;;  %v50_v6 = vsel %vm33_vm0, %v29_v55, 0  ;;  %v2384_v13 = vld [vmem:[%s2637_s4 + $0x8] sm:$0xff]  ;;  %v811_v33 = vld [vmem:[%s2635_s2 + $0x30] sm:$0xff] }
  0x11   :  { %1898 = vmatpush3.msra.mxu0 %v209_v44  ;;  %1970 = vmatmul.mubr.f32.vlgmr.msra.gmra.mrb[0].mxu1 %v918_v58  ;;  %v148_v8 = vand.u32 4294901760, %v147_v60  ;;  %v928_v9 = vand.u32 4294901760, %v927_v61  ;;  %v2377_v11 = vsub.f32 %v44_v59, %v2362_v62  ;;  %v2379_v12 = vand.u32 4294901760, %v47_v2  ;;  %v2401_v38 = vld [vmem:[%s2637_s4 + $0x28] sm:$0xff]  ;;  %v1589_v56 = vld [vmem:[%s2637_s4 + $0x20] sm:$0xff]  ;;  %v31_v61 = vld [vmem:[%s2633_s0 + $0x38] sm:$0xff] }
  0x12   :  { %1982 = vmatpush3.msra.mxu1 %v989_v51  ;;  %v2387_v14 = vsub.f32 %v824_v63, %v2368_v1  ;;  %v2389_v15 = vand.u32 4294901760, %v827_v5  ;;  %v2391_v22 = vand.u32 4294901760, %v50_v6  ;;  %v830_v23 = vsel %vm33_vm0, %v810_v0, 0  ;;  %1911 = vmatprep.subr.mxu0 %v2257_v16  ;;  %v2447_v63 = vld [vmem:[%s2637_s4 + $0x38] sm:$0xff] }
  0x13   :  { %1888 = vmatprep.mubr.f32.mxu0 %v148_v8  ;;  %1972 = vmatprep.mubr.f32.mxu1 %v928_v9  ;;  %v2645_v39 = vand.u32 4294901760, %v2377_v11  ;;  %v2405_v42 = vsub.f32 %v47_v2, %v2379_v12  ;;  %v2407_v44 = vand.u32 4294901760, %v830_v23  ;;  %v53_v45 = vsel %vm33_vm0, %v30_v7, 0 }
  0x14   :  { %v2642_v46 = vand.u32 4294901760, %v2387_v14  ;;  %v2412_v47 = vsub.f32 %v827_v5, %v2389_v15  ;;  %v2415_v48 = vsub.f32 %v50_v6, %v2391_v22  ;;  %v2417_v49 = vand.u32 4294901760, %v53_v45  ;;  %1995 = vmatprep.subr.mxu1 %v2271_v21  ;;  %1601 = vperm.xlu0 %2136, %v2384_v13  }
  0x15   :  { %v157_v50 = vsub.f32 %v2377_v11, %v2645_v39  ;;  %v2643_v51 = vand.u32 4294901760, %v2405_v42  ;;  %v2426_v54 = vsub.f32 %v830_v23, %v2407_v44  ;;  %v833_v55 = vsel %vm33_vm0, %v811_v33, 0  ;;  %1621 = vperm.xlu1 %2137, %v2401_v38   ;;  %v812_v33 = vld [vmem:[%s2635_s2 + $0x38] sm:$0xff] }
  0x16   :  { %v937_v57 = vsub.f32 %v2387_v14, %v2642_v46  ;;  %v2640_v58 = vand.u32 4294901760, %v2412_v47  ;;  %v2641_v59 = vand.u32 4294901760, %v2415_v48  ;;  %v2439_v60 = vsub.f32 %v53_v45, %v2417_v49 }
  0x17   :  { %v158_v0 = vand.u32 4294901760, %v157_v50  ;;  %v167_v2 = vsub.f32 %v2405_v42, %v2643_v51  ;;  %v2644_v5 = vand.u32 4294901760, %v2426_v54  ;;  %v2453_v6 = vand.u32 4294901760, %v833_v55 }
  0x18   :  { %v938_v7 = vand.u32 4294901760, %v937_v57  ;;  %v947_v8 = vsub.f32 %v2412_v47, %v2640_v58  ;;  %v177_v9 = vsub.f32 %v2415_v48, %v2641_v59  ;;  %v186_v23 = vand.u32 4294901760, %v2439_v60  ;;  %1616 = vperm.xlu0 %2136, %v1589_v56   ;;  %v1591_v59 = vld [vmem:[%s2637_s4 + $0x30] sm:$0xff] }
  0x19   :  { %1889 = vmatmul.mubr.f32.gmra.mrb[2].mxu0 %v158_v0  ;;  %v168_v45 = vand.u32 4294901760, %v167_v2  ;;  %v957_v50 = vsub.f32 %v2426_v54, %v2644_v5  ;;  %v2469_v57 = vsub.f32 %v833_v55, %v2453_v6  ;;  %v56_v58 = vsel %vm33_vm0, %v31_v61, 0  ;;  %1631 = vperm.xlu1 %2137, %v2447_v63  }
  0x1a   :  { %1973 = vmatmul.mubr.f32.gmra.mrb[2].mxu1 %v938_v7  ;;  %v948_v46 = vand.u32 4294901760, %v947_v8  ;;  %v178_v51 = vand.u32 4294901760, %v177_v9  ;;  %v187_v0 = vsub.f32 %v2439_v60, %v186_v23  ;;  %v2479_v2 = vand.u32 4294901760, %v56_v58 }
  0x1b   :  { %1891 = vmatprep.mubr.f32.mxu0 %v168_v45  ;;  %v958_v55 = vand.u32 4294901760, %v957_v50  ;;  %v966_v5 = vand.u32 4294901760, %v2469_v57  ;;  %v836_v61 = vsel %vm33_vm0, %v812_v33, 0  ;;  %v2181_v9 = vmov 1  }
  0x1c   :  { %1975 = vmatprep.mubr.f32.mxu1 %v948_v46  ;;  %v188_v39 = vand.u32 4294901760, %v187_v0  ;;  %v2484_v53 = vsub.f32 %v56_v58, %v2479_v2  ;;  %v2486_v7 = vand.u32 4294901760, %v836_v61  ;;  %1626 = vperm.xlu0 %2136, %v1591_v59  }
  0x1d   :  { %1892 = vmatmul.mubr.f32.gmra.mrb[4].mxu0 %v178_v51  ;;  %v967_v8 = vsub.f32 %v2469_v57, %v966_v5  ;;  %2139 = vset.pattern.permute.xlu1 %v2181_v9 }
  0x1e   :  { %1976 = vmatmul.mubr.f32.gmra.mrb[4].mxu1 %v958_v55  ;;  %1894 = vmatprep.mubr.f32.mxu0 %v188_v39  ;;  %v196_v45 = vand.u32 4294901760, %v2484_v53  ;;  %v2493_v46 = vsub.f32 %v836_v61, %v2486_v7 }
  0x1f   :  { %v968_v33 = vand.u32 4294901760, %v967_v8  ;;  %1715 = vperm.xlu1 %2139, %v2384_v13  }
  0x20   :  { %v197_v51 = vsub.f32 %v2484_v53, %v196_v45  ;;  %v976_v58 = vand.u32 4294901760, %v2493_v46  ;;  %2138 = vset.pattern.permute.xlu0 %v2181_v9 }
  0x21   :  { %1978 = vmatprep.mubr.f32.mxu1 %v968_v33  ;;  %1711 = vperm.xlu0 %2138, %v2309_v37  }
  0x22   :  { %v198_v50 = vand.u32 4294901760, %v197_v51  ;;  %v977_v39 = vsub.f32 %v2493_v46, %v976_v58 }
  0x23   :  { %1719 = vperm.xlu1 %2139, %v2298_v32  }
  0x24   :  { %1895 = vmatmul.mubr.f32.gmra.mrb[6].mxu0 %v198_v50  ;;  %v978_v0 = vand.u32 4294901760, %v977_v39 }
  0x25   :  { %1899 = vmatprep.mubr.f32.mxu0 %v2243_v10  ;;  %1723 = vperm.xlu0 %2138, %v2329_v43  }
  0x26   :  { %1979 = vmatmul.mubr.f32.gmra.mrb[6].mxu1 %v978_v0 }
  0x27   :  { %1983 = vmatprep.mubr.f32.mxu1 %v2259_v17  ;;  %1727 = vperm.xlu1 %2139, %v1589_v56  }
  0x28   :  { %1900 = vmatmul.mubr.f32.vlgmr.msra.gmra.mrb[0].mxu0 %v2261_v18 }
  0x29   :  { %1912 = vmatpush3.msra.mxu0 %v2257_v16  ;;  %1902 = vmatprep.mubr.f32.mxu0 %v2291_v30  ;;  %v2647_v16 = vand.u32 4294901760, %v2320_v41 }
  0x2a   :  { %1984 = vmatmul.mubr.f32.vlgmr.msra.gmra.mrb[0].mxu1 %v2263_v19  ;;  %1925 = vmatprep.subr.mxu0 %v2229_v3 }
  0x2b   :  { %1996 = vmatpush3.msra.mxu1 %v2271_v21  ;;  %1986 = vmatprep.mubr.f32.mxu1 %v2293_v31  ;;  %v2649_v21 = vand.u32 4294901760, %v2405_v42 }
  0x2c   :  { %1903 = vmatmul.mubr.f32.gmra.mrb[2].mxu0 %v2362_v62  ;;  %2009 = vmatprep.subr.mxu1 %v2231_v4 }
  0x2d   :  { %1905 = vmatprep.mubr.f32.mxu0 %v2379_v12  ;;  %1731 = vperm.xlu0 %2138, %v2401_v38  }
  0x2e   :  { %1987 = vmatmul.mubr.f32.gmra.mrb[2].mxu1 %v2368_v1  ;;  %1735 = vperm.xlu1 %2139, %v1591_v59  }
  0x2f   :  { %1989 = vmatprep.mubr.f32.mxu1 %v2389_v15 }
  0x30   :  { %1906 = vmatmul.mubr.f32.gmra.mrb[4].mxu0 %v2391_v22 }
  0x31   :  { %1908 = vmatprep.mubr.f32.mxu0 %v2417_v49  ;;  %1739 = vperm.xlu0 %2138, %v2447_v63  }
  0x32   :  { %1990 = vmatmul.mubr.f32.gmra.mrb[4].mxu1 %v2407_v44 }
  0x33   :  { %1992 = vmatprep.mubr.f32.mxu1 %v2453_v6 }
  0x34   :  { %1909 = vmatmul.mubr.f32.gmra.mrb[6].mxu0 %v2479_v2 }
  0x35   :  { %1913 = vmatprep.mubr.f32.mxu0 %v2267_v20  ;;  %v2648_v20 = vand.u32 4294901760, %v2377_v11 }
  0x36   :  { %1993 = vmatmul.mubr.f32.gmra.mrb[6].mxu1 %v2486_v7 }
  0x37   :  { %1997 = vmatprep.mubr.f32.mxu1 %v2279_v25  ;;  %v2651_v25 = vand.u32 4294901760, %v2412_v47 }
  0x38   :  { %1914 = vmatmul.mubr.f32.vlgmr.msra.gmra.mrb[0].mxu0 %v2282_v26  ;;  %v2652_v26 = vand.u32 4294901760, %v2415_v48 }
  0x39   :  { %1926 = vmatpush3.msra.mxu0 %v2229_v3  ;;  %1916 = vmatprep.mubr.f32.mxu0 %v2317_v40 }
  0x3a   :  { %1998 = vmatmul.mubr.f32.vlgmr.msra.gmra.mrb[0].mxu1 %v2285_v27  ;;  %1939 = vmatprep.subr.mxu0 %v2276_v24  ;;  %v2653_v27 = vand.u32 4294901760, %v2426_v54 }
  0x3b   :  { %2010 = vmatpush3.msra.mxu1 %v2231_v4  ;;  %2000 = vmatprep.mubr.f32.mxu1 %v2320_v41 }
  0x3c   :  { %1917 = vmatmul.mubr.f32.gmra.mrb[2].mxu0 %v2377_v11  ;;  %2023 = vmatprep.subr.mxu1 %v2289_v29 }
  0x3d   :  { %1919 = vmatprep.mubr.f32.mxu0 %v2405_v42 }
  0x3e   :  { %2001 = vmatmul.mubr.f32.gmra.mrb[2].mxu1 %v2387_v14 }
  0x3f   :  { %2003 = vmatprep.mubr.f32.mxu1 %v2412_v47 }
  0x40   :  { %1920 = vmatmul.mubr.f32.gmra.mrb[4].mxu0 %v2415_v48 }
  0x41   :  { %1922 = vmatprep.mubr.f32.mxu0 %v2439_v60 }
  0x42   :  { %2004 = vmatmul.mubr.f32.gmra.mrb[4].mxu1 %v2426_v54 }
  0x43   :  { %2006 = vmatprep.mubr.f32.mxu1 %v2469_v57 }
  0x44   :  { %1923 = vmatmul.mubr.f32.gmra.mrb[6].mxu0 %v2484_v53 }
  0x45   :  { %1927 = vmatprep.mubr.f32.mxu0 %v126_v28 }
  0x46   :  { %2007 = vmatmul.mubr.f32.gmra.mrb[6].mxu1 %v2493_v46 }
  0x47   :  { %2011 = vmatprep.mubr.f32.mxu1 %v906_v34 }
  0x48   :  { %1928 = vmatmul.mubr.f32.vlgmr.msra.gmra.mrb[0].mxu0 %v136_v35 }
  0x49   :  { %1940 = vmatpush3.msra.mxu0 %v2276_v24  ;;  %1930 = vmatprep.mubr.f32.mxu0 %v146_v52  ;;  %v2650_v24 = vand.u32 4294901760, %v2387_v14 }
  0x4a   :  { %2012 = vmatmul.mubr.f32.vlgmr.msra.gmra.mrb[0].mxu1 %v916_v36  ;;  %1953 = vmatprep.subr.mxu0 %v2229_v3 }
  0x4b   :  { %2024 = vmatpush3.msra.mxu1 %v2289_v29  ;;  %2014 = vmatprep.mubr.f32.mxu1 %v2647_v16 }
  0x4c   :  { %1931 = vmatmul.mubr.f32.gmra.mrb[2].mxu0 %v2648_v20  ;;  %2037 = vmatprep.subr.mxu1 %v2231_v4 }
  0x4d   :  { %1933 = vmatprep.mubr.f32.mxu0 %v2649_v21 }
  0x4e   :  { %2015 = vmatmul.mubr.f32.gmra.mrb[2].mxu1 %v2650_v24 }
  0x4f   :  { %2017 = vmatprep.mubr.f32.mxu1 %v2651_v25 }
  0x50   :  { %1934 = vmatmul.mubr.f32.gmra.mrb[4].mxu0 %v2652_v26 }
  0x51   :  { %1936 = vmatprep.mubr.f32.mxu0 %v186_v23 }
  0x52   :  { %2018 = vmatmul.mubr.f32.gmra.mrb[4].mxu1 %v2653_v27 }
  0x53   :  { %2020 = vmatprep.mubr.f32.mxu1 %v966_v5 }
  0x54   :  { %1937 = vmatmul.mubr.f32.gmra.mrb[6].mxu0 %v196_v45 }
  0x55   :  { %1941 = vmatprep.mubr.f32.mxu0 %v2243_v10 }
  0x56   :  { %2021 = vmatmul.mubr.f32.gmra.mrb[6].mxu1 %v976_v58 }
  0x57   :  { %2025 = vmatprep.mubr.f32.mxu1 %v2259_v17 }
  0x58   :  { %1942 = vmatmul.mubr.f32.vlgmr.msra.gmra.mrb[0].mxu0 %v2261_v18 }
  0x59   :  { %1954 = vmatpush3.msra.mxu0 %v2229_v3  ;;  %1944 = vmatprep.mubr.f32.mxu0 %v2291_v30 }
  0x5a   :  { %2026 = vmatmul.mubr.f32.vlgmr.msra.gmra.mrb[0].mxu1 %v2263_v19 }
  0x5b   :  { %2038 = vmatpush3.msra.mxu1 %v2231_v4  ;;  %2028 = vmatprep.mubr.f32.mxu1 %v2293_v31 }
  0x5c   :  { %1945 = vmatmul.mubr.f32.gmra.mrb[2].mxu0 %v2362_v62 }
  0x5d   :  { %1947 = vmatprep.mubr.f32.mxu0 %v2379_v12 }
  0x5e   :  { %2029 = vmatmul.mubr.f32.gmra.mrb[2].mxu1 %v2368_v1 }
  0x5f   :  { %2031 = vmatprep.mubr.f32.mxu1 %v2389_v15 }
  0x60   :  { %1948 = vmatmul.mubr.f32.gmra.mrb[4].mxu0 %v2391_v22 }
  0x61   :  { %1950 = vmatprep.mubr.f32.mxu0 %v2417_v49 }
  0x62   :  { %2032 = vmatmul.mubr.f32.gmra.mrb[4].mxu1 %v2407_v44 }
  0x63   :  { %2034 = vmatprep.mubr.f32.mxu1 %v2453_v6 }
  0x64   :  { %1951 = vmatmul.mubr.f32.gmra.mrb[6].mxu0 %v2479_v2 }
  0x65   :  { %1955 = vmatprep.mubr.f32.mxu0 %v2243_v10 }
  0x66   :  { %2035 = vmatmul.mubr.f32.gmra.mrb[6].mxu1 %v2486_v7 }
  0x67   :  { %2039 = vmatprep.mubr.f32.mxu1 %v2259_v17 }
  0x68   :  { %1956 = vmatmul.mubr.f32.vlgmr.msra.gmra.mrb[0].mxu0 %v2261_v18  ;;  %v1774_v18 = vld [vmem:[%s2638_s5] ss:$0 sm:$0xff]  ;;  %s2182_s5 = smov [#allocation2]  }
  0x69   :  { %1958 = vmatprep.mubr.f32.mxu0 %v2291_v30  ;;  %s1763_s20 = sshll.u32 %s2182_s5, 4  ;;  %s1764_s20 = int_to_ptr.vmem [resolvable:$true] %s1763_s20 }
  0x6a   :  { %2040 = vmatmul.mubr.f32.vlgmr.msra.gmra.mrb[0].mxu1 %v2263_v19  ;;  %s2156_s21 = scalar_lea.vmem %s1764_s20, 1024  ;;  %p2161_p1 = scmp.lt.s32.totalorder %s1764_s20, %s1764_s20 }
  0x6b   :  { %2042 = vmatprep.mubr.f32.mxu1 %v2293_v31  ;;  %p2157_p0 = scmp.ne.s32.totalorder %s1764_s20, %s2156_s21  ;;  %p2162_p2 = scmp.lt.s32.totalorder %s2156_s21, %s2156_s21 }
  0x6c   :  { %1959 = vmatmul.mubr.f32.gmra.mrb[2].mxu0 %v2362_v62 }
  0x6d   :  { %1961 = vmatprep.mubr.f32.mxu0 %v2379_v12  ;;  %p2163_p3 = por %p2162_p2, %p2161_p1 }
  0x6e   :  { %2043 = vmatmul.mubr.f32.gmra.mrb[2].mxu1 %v2368_v1 }
  0x6f   :  { %2045 = vmatprep.mubr.f32.mxu1 %v2389_v15  ;;  %p2164_p4 = pnand %p2163_p3, %p2157_p0 }
  0x70   :  { %1962 = vmatmul.mubr.f32.gmra.mrb[4].mxu0 %v2391_v22 }
  0x71   :  { %1964 = vmatprep.mubr.f32.mxu0 %v2417_v49 }
  0x72   :  { %2046 = vmatmul.mubr.f32.gmra.mrb[4].mxu1 %v2407_v44 }
  0x73   :  { %2048 = vmatprep.mubr.f32.mxu1 %v2453_v6 }
  0x74   :  { %1965 = vmatmul.mubr.f32.gmra.mrb[6].mxu0 %v2479_v2 }
  0x76   :  { %2049 = vmatmul.mubr.f32.gmra.mrb[6].mxu1 %v2486_v7 }
  0x83   :  { %v1607_v3 = vpop.permute.xlu1 %1606 }
  0x84   :  { %v1640_v43 = vadd.f32 %v1774_v18, %v1607_v3 }
  0x85   :  { %v1597_v4 = vpop.permute.xlu0 %1596 }
  0x86   :  { %v1638_v30 = vadd.f32 %v1774_v18, %v1597_v4 }
  0x8c   :  { %v1612_v10 = vpop.permute.xlu1 %1611 }
  0x8d   :  { %v1641_v52 = vadd.f32 %v1774_v18, %v1612_v10 }
  0x93   :  { %v1602_v17 = vpop.permute.xlu0 %1601 }
  0x94   :  { %v1622_v19 = vpop.permute.xlu1 %1621  ;;  %v1639_v28 = vadd.f32 %v1774_v18, %v1602_v17 }
  0x95   :  { %v1643_v12 = vadd.f32 %v1774_v18, %v1622_v19 }
  0x97   :  { %v1617_v29 = vpop.permute.xlu0 %1616 }
  0x98   :  { %v1632_v53 = vpop.permute.xlu1 %1631  ;;  %v1642_v42 = vadd.f32 %v1774_v18, %v1617_v29 }
  0x99   :  { %v1645_v56 = vadd.f32 %v1774_v18, %v1632_v53 }
  0x9b   :  { %v1627_v15 = vpop.permute.xlu0 %1626 }
  0x9c   :  { %v1644_v5 = vadd.f32 %v1774_v18, %v1627_v15 }
 0x13b   :  { %v1957_v31 = vpop.f32.mrb[0].mxu0 }
 0x13c   :  { %v1647_v32 = vmul.f32 2.0, %v1957_v31  ;;  %v759_v34 = vpop.f32.mrb[1].mxu0  ;;  %v1712_v31 = vpop.permute.xlu0 %1711 }
 0x13d   :  { %v2041_v35 = vpop.f32.mrb[0].mxu1  ;;  %v1646_v36 = vmul.f32 2.0, %v759_v34 }
 0x13e   :  { %v1655_v37 = vsub.f32 %v1639_v28, %v1647_v32  ;;  %v1671_v40 = vsub.f32 2.0, %v2041_v35  ;;  %v1539_v41 = vpop.f32.mrb[1].mxu1 }
 0x13f   :  { %v1654_v62 = vsub.f32 %v1638_v30, %v1646_v36  ;;  %v1670_v1 = vsub.f32 2.0, %v1539_v41  ;;  %v1960_v11 = vpop.f32.mrb[2].mxu0 }
 0x140   :  { %v1663_v13 = vsub.f32 0.0, %v1655_v37  ;;  %v1679_v14 = vmul.f32 %v1671_v40, %v1671_v40  ;;  %v1649_v22 = vmul.f32 2.0, %v1960_v11  ;;  %v771_v38 = vpop.f32.mrb[3].mxu0  ;;  %v1716_v37 = vpop.permute.xlu1 %1715 }
 0x141   :  { %v1662_v44 = vsub.f32 0.0, %v1654_v62  ;;  %v1678_v47 = vmul.f32 %v1670_v1, %v1670_v1  ;;  %v2044_v48 = vpop.f32.mrb[2].mxu1  ;;  %v1648_v49 = vmul.f32 2.0, %v771_v38 }
 0x142   :  { %v1687_v54 = vmul.f32 %v1679_v14, %v1663_v13  ;;  %v1657_v59 = vsub.f32 %v1641_v52, %v1649_v22  ;;  %v1673_v60 = vsub.f32 2.0, %v2044_v48  ;;  %v1551_v63 = vpop.f32.mrb[3].mxu1  ;;  %v1724_v22 = vpop.permute.xlu0 %1723 }
 0x143   :  { %v1686_v6 = vmul.f32 %v1678_v47, %v1662_v44  ;;  %v1656_v23 = vsub.f32 %v1640_v43, %v1648_v49  ;;  %v1672_v57 = vsub.f32 2.0, %v1551_v63  ;;  %v1963_v2 = vpop.f32.mrb[4].mxu0 }
 0x144   :  { %v1696_v55 = vmul.f32 1.442695, %v1687_v54  ;;  %v1665_v61 = vsub.f32 0.0, %v1657_v59  ;;  %v1681_v7 = vmul.f32 %v1673_v60, %v1673_v60  ;;  %v1651_v8 = vmul.f32 2.0, %v1963_v2  ;;  %v783_v9 = vpop.f32.mrb[5].mxu0  ;;  %v1720_v47 = vpop.permute.xlu1 %1719 }
 0x145   :  { %v1694_v45 = vmul.f32 1.442695, %v1686_v6  ;;  %v1664_v46 = vsub.f32 0.0, %v1656_v23  ;;  %v1680_v33 = vmul.f32 %v1672_v57, %v1672_v57  ;;  %v2047_v51 = vpop.f32.mrb[4].mxu1  ;;  %v1650_v58 = vmul.f32 2.0, %v783_v9 }
 0x146   :  { %2140 = vpow2.f32 %v1696_v55  ;;  %v1689_v50 = vmul.f32 %v1681_v7, %v1665_v61  ;;  %v1659_v39 = vsub.f32 %v1643_v12, %v1651_v8  ;;  %v1675_v0 = vsub.f32 2.0, %v2047_v51  ;;  %v1563_v16 = vpop.f32.mrb[5].mxu1  ;;  %v1732_v60 = vpop.permute.xlu0 %1731 }
 0x147   :  { %2142 = vpow2.f32 %v1694_v45  ;;  %v1688_v20 = vmul.f32 %v1680_v33, %v1664_v46  ;;  %v1658_v21 = vsub.f32 %v1642_v42, %v1650_v58  ;;  %v1674_v24 = vsub.f32 2.0, %v1563_v16  ;;  %v1966_v25 = vpop.f32.mrb[6].mxu0 }
 0x148   :  { %v1700_v26 = vmul.f32 1.442695, %v1689_v50  ;;  %v1667_v27 = vsub.f32 0.0, %v1659_v39  ;;  %v1683_v3 = vmul.f32 %v1675_v0, %v1675_v0  ;;  %v1653_v4 = vmul.f32 2.0, %v1966_v25  ;;  %v795_v10 = vpop.f32.mrb[7].mxu0  ;;  %v1728_v63 = vpop.permute.xlu1 %1727 }
 0x149   :  { %v1698_v17 = vmul.f32 1.442695, %v1688_v20  ;;  %v1666_v18 = vsub.f32 0.0, %v1658_v21  ;;  %v1682_v19 = vmul.f32 %v1674_v24, %v1674_v24  ;;  %v2050_v28 = vpop.f32.mrb[6].mxu1  ;;  %v1652_v29 = vmul.f32 2.0, %v795_v10 }
 0x14a   :  { %2144 = vpow2.f32 %v1700_v26  ;;  %v1691_v30 = vmul.f32 %v1683_v3, %v1667_v27  ;;  %v1661_v32 = vsub.f32 %v1645_v56, %v1653_v4  ;;  %v1677_v34 = vsub.f32 2.0, %v2050_v28  ;;  %v1575_v35 = vpop.f32.mrb[7].mxu1  ;;  %v1740_v55 = vpop.permute.xlu0 %1739 }
 0x14b   :  { %2146 = vpow2.f32 %v1698_v17  ;;  %v1690_v36 = vmul.f32 %v1682_v19, %v1666_v18  ;;  %v1660_v40 = vsub.f32 %v1644_v5, %v1652_v29  ;;  %v1676_v41 = vsub.f32 2.0, %v1575_v35 }
 0x14c   :  { %v1704_v43 = vmul.f32 1.442695, %v1691_v30  ;;  %v1669_v52 = vsub.f32 0.0, %v1661_v32  ;;  %v1685_v53 = vmul.f32 %v1677_v34, %v1677_v34  ;;  %v1736_v7 = vpop.permute.xlu1 %1735 }
 0x14d   :  { %v1702_v62 = vmul.f32 1.442695, %v1690_v36  ;;  %v1668_v1 = vsub.f32 0.0, %v1660_v40  ;;  %v1684_v11 = vmul.f32 %v1676_v41, %v1676_v41 }
 0x14e   :  { %2148 = vpow2.f32 %v1704_v43  ;;  %v1693_v12 = vmul.f32 %v1685_v53, %v1669_v52 }
 0x14f   :  { %2150 = vpow2.f32 %v1702_v62  ;;  %v1692_v13 = vmul.f32 %v1684_v11, %v1668_v1 }
 0x150   :  { %v2141_v14 = vpop.eup %2140  ;;  %v1708_v15 = vmul.f32 1.442695, %v1693_v12 }
 0x151   :  { %v2143_v38 = vpop.eup %2142  ;;  %v1743_v42 = vmul.f32 %v2141_v14, %v1716_v37  ;;  %v1706_v44 = vmul.f32 1.442695, %v1692_v13 }
 0x152   :  { %v1742_v48 = vmul.f32 %v2143_v38, %v1712_v31  ;;  %2152 = vpow2.f32 %v1708_v15 }
 0x153   :  { %1751 = vst [vmem:[#allocation2 + $0x8] sm:$0xff] %v1743_v42  ;;  %2154 = vpow2.f32 %v1706_v44 }
 0x154   :  { %v2145_v49 = vpop.eup %2144  ;;  %1750 = vst [vmem:[#allocation2] sm:$0xff] %v1742_v48 }
 0x155   :  { %v2147_v54 = vpop.eup %2146  ;;  %v1745_v56 = vmul.f32 %v2145_v49, %v1724_v22 }
 0x156   :  { %v1744_v59 = vmul.f32 %v2147_v54, %v1720_v47 }
 0x157   :  { %1753 = vst [vmem:[#allocation2 + $0x18] sm:$0xff] %v1745_v56 }
 0x158   :  { %v2149_v5 = vpop.eup %2148  ;;  %1752 = vst [vmem:[#allocation2 + $0x10] sm:$0xff] %v1744_v59 }
 0x159   :  { %v2151_v6 = vpop.eup %2150  ;;  %v1747_v23 = vmul.f32 %v2149_v5, %v1732_v60 }
 0x15a   :  { %v1746_v57 = vmul.f32 %v2151_v6, %v1728_v63 }
 0x15b   :  { %1755 = vst [vmem:[#allocation2 + $0x28] sm:$0xff] %v1747_v23 }
 0x15c   :  { %v2153_v2 = vpop.eup %2152  ;;  %1754 = vst [vmem:[#allocation2 + $0x20] sm:$0xff] %v1746_v57 }
 0x15d   :  { %v2155_v61 = vpop.eup %2154  ;;  %v1749_v8 = vmul.f32 %v2153_v2, %v1740_v55 }
 0x15e   :  { %v1748_v9 = vmul.f32 %v2155_v61, %v1736_v7 }
 0x15f   :  { %1757 = vst [vmem:[#allocation2 + $0x38] sm:$0xff] %v1749_v8 }
 0x160   :  { %1756 = vst [vmem:[#allocation2 + $0x30] sm:$0xff] %v1748_v9 }
 0x161   :  { %2167 = shalt.err (!%p2164_p4)
}
 0x162   :  { %s2168_s24 = scalar_lea.hbm %s2639_s6, 1024 }
 0x163   :  { %p2169_p5 = scmp.ne.s32.totalorder %s2639_s6, %s2168_s24  ;;  %p2172_p6 = scmp.lt.u32.totalorder %s2168_s24, %s2639_s6 }
 0x165   :  { %p2174_p7 = pnand %p2172_p6, %p2169_p5 }
 0x167   :  { %2177 = shalt.err (!%p2174_p7)
}
 0x168   :  { %s2183_s1 = smov 128   ;;  %s2184_s29 = smov 8  }
 0x169   :  { %1769 = dma.vmem_to_hbm [thread:$0]  %s1764_s20, 1024, %s2639_s6, [#allocation3], %s2183_s1, %s2183_s1, %s2184_s29  }
 0x16a   :  { %2178 = dma.done.wait [#allocation3], 1024  }
 0x16b   :  { %2179 = vsyncadd [#allocation3], 4294966272 }
 0x16c   :  { %1773 = vsyncpa [#allocation3], 1 }

</bundles_post_ra>
